<compile_context>
chip_gen: v7x
topology: tpu7x:2x2x1
jax: 0.10.0
libtpu: 0.0.40
codegen_flags: <defaults>
</compile_context>

<pallas_src>
import jax
import jax.numpy as jnp
from jax.experimental import pallas as pl
from jax.experimental.pallas import tpu as pltpu


def _cnn_kernel(x_ref, wc_ref, bc_ref, w1_ref, b1_ref, w2_ref, b2_ref, out_ref):
    """One batch tile per grid step.

    x_ref : (TB, L*C)       flattened input, index = t*C + c
    wc_ref: (L*C, 2*Cp)     conv-as-matmul weights, cols = [even t | odd t], padded
    bc_ref: (1, 2*Cp)       conv bias (tiled per time step, padded with zeros)
    w1_ref: (Cp, Hp)        fc1 weights (flatten order folded in, padded)
    b1_ref: (1, Hp)         fc1 bias (padded)
    w2_ref: (Hp, 1)         fc2 weights (padded, transposed)
    b2_ref: (1, 1)          fc2 bias
    out_ref: (TB, 1)        per-step output block
    """
    xb = x_ref[...]                                             # (TB, L*C)

    # Conv1d (valid) + bias + ReLU as a single MXU matmul.
    conv = jnp.dot(xb, wc_ref[...], preferred_element_type=jnp.float32)
    conv = jnp.maximum(conv + bc_ref[...], 0.0)                 # (TB, 2*Cp)

    # MaxPool1d(2): even-time half vs odd-time half (both 128-aligned, Cp wide).
    half = conv.shape[1] // 2
    pooled = jnp.maximum(conv[:, :half], conv[:, half:])        # (TB, Cp)

    # fc1 (flatten folded into w1 layout) + ReLU.
    h1 = jnp.dot(pooled, w1_ref[...], preferred_element_type=jnp.float32)
    h1 = jnp.maximum(h1 + b1_ref[...], 0.0)                     # (TB, Hp)

    # fc2.
    y = jnp.dot(h1, w2_ref[...], preferred_element_type=jnp.float32) + b2_ref[...]
    out_ref[...] = y                                            # (TB, 1)


@jax.jit
def cnn_forward(x_ncl, conv_w, conv_b, fc1_w, fc1_b, fc2_w, fc2_b):
    """x_ncl: (B, C, L) float32, exactly like the PyTorch module input."""
    B, C, L = x_ncl.shape
    OC, _, K = conv_w.shape            # (64, C, 3)
    Lout = L - K + 1
    Lp = Lout // 2
    H = fc1_w.shape[0]                 # 50
    Hp = ((H + 63) // 64) * 64         # pad hidden dim for clean tiles
    Cp = ((Lp * OC + 127) // 128) * 128  # 128-aligned pooled width (448 -> 512)

    # ---- batch tiling: pick tile count then the smallest 8-aligned tile ----
    MAX_TB = 512
    B8 = ((B + 7) // 8) * 8
    num_tiles = max(1, (B8 + MAX_TB - 1) // MAX_TB)
    TB = (((B + num_tiles - 1) // num_tiles + 7) // 8) * 8
    B_pad = TB * num_tiles

    # ---- input: (B, C, L) -> (B, L*C), index t*C + c ----
    x = jnp.transpose(x_ncl, (0, 2, 1)).reshape(B, L * C).astype(jnp.float32)
    if B_pad != B:
        x = jnp.pad(x, ((0, B_pad - B), (0, 0)))

    # ---- conv weights as one dense (L*C, 2*Cp) matrix ----
    # W4[t_in, c, t_out, o] = conv_w[o, c, t_in - t_out] for 0 <= t_in - t_out < K.
    wc = jnp.transpose(conv_w, (2, 1, 0)).astype(jnp.float32)       # (K, C, OC)
    eye = jnp.eye(Lout, dtype=jnp.float32)
    W4 = jnp.zeros((L, C, Lout, OC), jnp.float32)
    for k in range(K):
        W4 = W4.at[k:k + Lout].add(jnp.einsum('ab,co->acbo', eye, wc[k]))
    Wrows = W4.reshape(L * C, Lout, OC)                              # rows: t_in*C + c
    # Column order: [t_out even (Lp blocks of OC) | t_out odd (Lp blocks of OC)];
    # time steps >= 2*Lp (dropped by the pool) are omitted; each half is padded
    # to Cp columns so the in-kernel pool slices stay 128-lane-aligned.
    pad_cols = Cp - Lp * OC
    w_even = Wrows[:, 0:2 * Lp:2, :].reshape(L * C, Lp * OC)
    w_odd = Wrows[:, 1:2 * Lp:2, :].reshape(L * C, Lp * OC)
    w_even = jnp.pad(w_even, ((0, 0), (0, pad_cols)))
    w_odd = jnp.pad(w_odd, ((0, 0), (0, pad_cols)))
    Wconv = jnp.concatenate([w_even, w_odd], axis=1)                 # (L*C, 2*Cp)
    bc_half = jnp.pad(jnp.tile(conv_b.astype(jnp.float32), Lp), (0, pad_cols))
    bconv = jnp.concatenate([bc_half, bc_half]).reshape(1, 2 * Cp)

    # ---- fc1: fold PyTorch channel-major flatten (o*Lp + p) into weight layout ----
    # pooled column index is p*OC + o, so W1[p*OC + o, j] = fc1_w[j, o*Lp + p].
    W1 = jnp.transpose(
        fc1_w.astype(jnp.float32).reshape(H, OC, Lp), (2, 1, 0)).reshape(Lp * OC, H)
    W1 = jnp.pad(W1, ((0, Cp - Lp * OC), (0, Hp - H)))               # (Cp, Hp)
    b1 = jnp.pad(fc1_b.astype(jnp.float32), (0, Hp - H)).reshape(1, Hp)

    # ---- fc2 (pad rows to Hp; padded h1 columns are exactly zero) ----
    W2 = jnp.pad(jnp.transpose(fc2_w.astype(jnp.float32)), ((0, Hp - H), (0, 0)))  # (Hp, 1)
    b2 = fc2_b.astype(jnp.float32).reshape(1, 1)

    out = pl.pallas_call(
        _cnn_kernel,
        out_shape=jax.ShapeDtypeStruct((B_pad, 1), jnp.float32),
        grid=(num_tiles,),
        in_specs=[
            pl.BlockSpec((TB, L * C), lambda b: (b, 0)),
            pl.BlockSpec((L * C, 2 * Cp), lambda b: (0, 0)),
            pl.BlockSpec((1, 2 * Cp), lambda b: (0, 0)),
            pl.BlockSpec((Cp, Hp), lambda b: (0, 0)),
            pl.BlockSpec((1, Hp), lambda b: (0, 0)),
            pl.BlockSpec((Hp, 1), lambda b: (0, 0)),
            pl.BlockSpec((1, 1), lambda b: (0, 0)),
        ],
        out_specs=pl.BlockSpec((TB, 1), lambda b: (b, 0)),
        compiler_params=pltpu.CompilerParams(
            dimension_semantics=("parallel",)),
    )(x, Wconv, bconv, W1, b1, W2, b2)
    return out[:B]


def ref_forward(x_ncl, conv_w, conv_b, fc1_w, fc1_b, fc2_w, fc2_b):
    """Pure-JAX reference reproducing the PyTorch forward exactly (NCL layout)."""
    y = jax.lax.conv_general_dilated(
        x_ncl, conv_w, window_strides=(1,), padding="VALID",
        dimension_numbers=("NCH", "OIH", "NCH"))
    y = jax.nn.relu(y + conv_b[None, :, None])
    B, OC, Lout = y.shape
    Lp = Lout // 2
    y = y[:, :, :Lp * 2].reshape(B, OC, Lp, 2).max(axis=-1)
    y = y.reshape(B, -1)                      # channel-major flatten, like torch .view
    y = jax.nn.relu(y @ fc1_w.T + fc1_b)
    y = y @ fc2_w.T + fc2_b
    return y


def _make_inputs(key, B, C, L, OC, K, H):
    Lp = (L - K + 1) // 2
    flat = OC * Lp
    ks = jax.random.split(key, 7)
    x = jax.random.normal(ks[0], (B, C, L), dtype=jnp.float32)
    conv_w = 0.1 * jax.random.normal(ks[1], (OC, C, K), dtype=jnp.float32)
    conv_b = 0.1 * jax.random.normal(ks[2], (OC,), dtype=jnp.float32)
    fc1_w = 0.05 * jax.random.normal(ks[3], (H, flat), dtype=jnp.float32)
    fc1_b = 0.05 * jax.random.normal(ks[4], (H,), dtype=jnp.float32)
    fc2_w = 0.05 * jax.random.normal(ks[5], (1, H), dtype=jnp.float32)
    fc2_b = 0.05 * jax.random.normal(ks[6], (1,), dtype=jnp.float32)
    return x, conv_w, conv_b, fc1_w, fc1_b, fc2_w, fc2_b


if __name__ == "__main__":
    OC, K, H = 64, 3, 50
    key = jax.random.PRNGKey(0)

    # Primary small check: sequence_length=16, num_features=4, batch=2.
    args = _make_inputs(key, B=2, C=4, L=16, OC=OC, K=K, H=H)
    out = jax.block_until_ready(cnn_forward(*args))
    ref = ref_forward(*args)
    assert out.shape == (2, 1), out.shape
    assert jnp.allclose(out, ref, rtol=1e-5, atol=1e-5), (out, ref)

    # Secondary check: multi-tile grid path with batch padding (B=1100 -> 3 tiles).
    args2 = _make_inputs(jax.random.PRNGKey(0), B=1100, C=4, L=16, OC=OC, K=K, H=H)
    out2 = jax.block_until_ready(cnn_forward(*args2))
    ref2 = ref_forward(*args2)
    assert out2.shape == (1100, 1), out2.shape
    assert jnp.allclose(out2, ref2, rtol=1e-5, atol=1e-5)

    print("KERNEL_OK")
</pallas_src>

<mosaic_0001>
module attributes {stable_mosaic.version = 11 : i64} {
  func.func @_cnn_kernel(%arg0: i32, %arg1: memref<8x64xf32, #tpu.memory_space<vmem>>, %arg2: memref<64x1024xf32, #tpu.memory_space<vmem>>, %arg3: memref<1x1024xf32, #tpu.memory_space<vmem>>, %arg4: memref<512x64xf32, #tpu.memory_space<vmem>>, %arg5: memref<1x64xf32, #tpu.memory_space<vmem>>, %arg6: memref<64x1xf32, #tpu.memory_space<vmem>>, %arg7: memref<1x1xf32, #tpu.memory_space<vmem>>, %arg8: memref<8x1xf32, #tpu.memory_space<vmem>>) attributes {dimension_semantics = [#tpu.dimension_semantics<parallel>], iteration_bounds = array<i64: 1>, scalar_prefetch = 0 : i64, scratch_operands = 0 : i64, tpu.core_type = #tpu.core_type<tc>, window_params = [{transform_indices = @transform_0, window_bounds = array<i64: 8, 64>}, {pipeline_mode = #tpu.pipeline_mode<synchronous>, transform_indices = @transform_1, window_bounds = array<i64: 64, 1024>}, {pipeline_mode = #tpu.pipeline_mode<synchronous>, transform_indices = @transform_2, window_bounds = array<i64: 1, 1024>}, {pipeline_mode = #tpu.pipeline_mode<synchronous>, transform_indices = @transform_3, window_bounds = array<i64: 512, 64>}, {pipeline_mode = #tpu.pipeline_mode<synchronous>, transform_indices = @transform_4, window_bounds = array<i64: 1, 64>}, {pipeline_mode = #tpu.pipeline_mode<synchronous>, transform_indices = @transform_5, window_bounds = array<i64: 64, 1>}, {pipeline_mode = #tpu.pipeline_mode<synchronous>, transform_indices = @transform_6, window_bounds = array<i64: 1, 1>}, {transform_indices = @transform_7, window_bounds = array<i64: 8, 1>}]} {
    %c0 = arith.constant 0 : index
    %c0_0 = arith.constant 0 : index
    %0 = vector.load %arg1[%c0, %c0_0] : memref<8x64xf32, #tpu.memory_space<vmem>>, vector<8x64xf32>
    %c0_1 = arith.constant 0 : index
    %c0_2 = arith.constant 0 : index
    %1 = vector.load %arg2[%c0_1, %c0_2] : memref<64x1024xf32, #tpu.memory_space<vmem>>, vector<64x1024xf32>
    %cst = arith.constant dense<0.000000e+00> : vector<8x1024xf32>
    %2 = tpu.matmul %0, %1, %cst {dimension_numbers = #tpu.dot_dimension_numbers<[1], [0], [0], [1], [0, 0, 1, 1], [], []>} : vector<8x64xf32>, vector<64x1024xf32>, vector<8x1024xf32> -> vector<8x1024xf32>
    %c0_3 = arith.constant 0 : index
    %c0_4 = arith.constant 0 : index
    %3 = vector.load %arg3[%c0_3, %c0_4] : memref<1x1024xf32, #tpu.memory_space<vmem>>, vector<1x1024xf32>
    %4 = vector.broadcast %3 : vector<1x1024xf32> to vector<8x1024xf32>
    %5 = arith.addf %2, %4 : vector<8x1024xf32>
    %cst_5 = arith.constant 0.000000e+00 : f32
    %6 = vector.broadcast %cst_5 : f32 to vector<8x1024xf32>
    %7 = arith.maximumf %5, %6 : vector<8x1024xf32>
    %8 = vector.extract_strided_slice %7 {offsets = [0, 0], sizes = [8, 512], strides = [1, 1]} : vector<8x1024xf32> to vector<8x512xf32>
    %9 = vector.extract_strided_slice %7 {offsets = [0, 512], sizes = [8, 512], strides = [1, 1]} : vector<8x1024xf32> to vector<8x512xf32>
    %10 = arith.maximumf %8, %9 : vector<8x512xf32>
    %c0_6 = arith.constant 0 : index
    %c0_7 = arith.constant 0 : index
    %11 = vector.load %arg4[%c0_6, %c0_7] : memref<512x64xf32, #tpu.memory_space<vmem>>, vector<512x64xf32>
    %cst_8 = arith.constant dense<0.000000e+00> : vector<8x64xf32>
    %12 = tpu.matmul %10, %11, %cst_8 {dimension_numbers = #tpu.dot_dimension_numbers<[1], [0], [0], [1], [0, 0, 1, 1], [], []>} : vector<8x512xf32>, vector<512x64xf32>, vector<8x64xf32> -> vector<8x64xf32>
    %c0_9 = arith.constant 0 : index
    %c0_10 = arith.constant 0 : index
    %13 = vector.load %arg5[%c0_9, %c0_10] : memref<1x64xf32, #tpu.memory_space<vmem>>, vector<1x64xf32>
    %14 = vector.broadcast %13 : vector<1x64xf32> to vector<8x64xf32>
    %15 = arith.addf %12, %14 : vector<8x64xf32>
    %cst_11 = arith.constant 0.000000e+00 : f32
    %16 = vector.broadcast %cst_11 : f32 to vector<8x64xf32>
    %17 = arith.maximumf %15, %16 : vector<8x64xf32>
    %c0_12 = arith.constant 0 : index
    %c0_13 = arith.constant 0 : index
    %18 = vector.load %arg6[%c0_12, %c0_13] : memref<64x1xf32, #tpu.memory_space<vmem>>, vector<64x1xf32>
    %cst_14 = arith.constant dense<0.000000e+00> : vector<8x1xf32>
    %19 = tpu.matmul %17, %18, %cst_14 {dimension_numbers = #tpu.dot_dimension_numbers<[1], [0], [0], [1], [0, 0, 1, 1], [], []>} : vector<8x64xf32>, vector<64x1xf32>, vector<8x1xf32> -> vector<8x1xf32>
    %c0_15 = arith.constant 0 : index
    %c0_16 = arith.constant 0 : index
    %20 = vector.load %arg7[%c0_15, %c0_16] : memref<1x1xf32, #tpu.memory_space<vmem>>, vector<1x1xf32>
    %21 = vector.broadcast %20 : vector<1x1xf32> to vector<8x1xf32>
    %22 = arith.addf %19, %21 : vector<8x1xf32>
    %c0_17 = arith.constant 0 : index
    %c0_18 = arith.constant 0 : index
    %23 = vector.load %arg8[%c0_17, %c0_18] : memref<8x1xf32, #tpu.memory_space<vmem>>, vector<8x1xf32>
    tpu.vector_store %arg8[%c0_17, %c0_18], %22 {strides = array<i32>} : memref<8x1xf32, #tpu.memory_space<vmem>>, vector<8x1xf32>,
    return
  }
  func.func @transform_0(%arg0: i32) -> (i32, i32) {
    %c0_i32 = arith.constant 0 : i32
    %c0_i32_0 = arith.constant 0 : i32
    return %arg0, %c0_i32 : i32, i32
  }
  func.func @transform_1(%arg0: i32) -> (i32, i32) {
    %c0_i32 = arith.constant 0 : i32
    %c0_i32_0 = arith.constant 0 : i32
    %c0_i32_1 = arith.constant 0 : i32
    return %c0_i32, %c0_i32_0 : i32, i32
  }
  func.func @transform_2(%arg0: i32) -> (i32, i32) {
    %c0_i32 = arith.constant 0 : i32
    %c0_i32_0 = arith.constant 0 : i32
    %c0_i32_1 = arith.constant 0 : i32
    return %c0_i32, %c0_i32_0 : i32, i32
  }
  func.func @transform_3(%arg0: i32) -> (i32, i32) {
    %c0_i32 = arith.constant 0 : i32
    %c0_i32_0 = arith.constant 0 : i32
    %c0_i32_1 = arith.constant 0 : i32
    return %c0_i32, %c0_i32_0 : i32, i32
  }
  func.func @transform_4(%arg0: i32) -> (i32, i32) {
    %c0_i32 = arith.constant 0 : i32
    %c0_i32_0 = arith.constant 0 : i32
    %c0_i32_1 = arith.constant 0 : i32
    return %c0_i32, %c0_i32_0 : i32, i32
  }
  func.func @transform_5(%arg0: i32) -> (i32, i32) {
    %c0_i32 = arith.constant 0 : i32
    %c0_i32_0 = arith.constant 0 : i32
    %c0_i32_1 = arith.constant 0 : i32
    return %c0_i32, %c0_i32_0 : i32, i32
  }
  func.func @transform_6(%arg0: i32) -> (i32, i32) {
    %c0_i32 = arith.constant 0 : i32
    %c0_i32_0 = arith.constant 0 : i32
    %c0_i32_1 = arith.constant 0 : i32
    return %c0_i32, %c0_i32_0 : i32, i32
  }
  func.func @transform_7(%arg0: i32) -> (i32, i32) {
    %c0_i32 = arith.constant 0 : i32
    %c0_i32_0 = arith.constant 0 : i32
    return %arg0, %c0_i32 : i32, i32
  }
}

</mosaic_0001>

<bundles_post_ra>
// kernel: tile.8
= control target key start
LH: loop header
LB: loop body
LE: loop exit
PB: predicated region body
PF: predicated region fallthrough
CT: control target
= control target key end

     0   :  { %s22_s0 = inlined_call_operand.vmem [shape: f32[64], index: 0, kind: input, shape index: {}]   ;;  %s23_s1 = inlined_call_operand.vmem [shape: f32[7,64], index: 1, kind: output, shape index: {}]  }
   0x1   :  { %v4_v0 = vld [vmem:[%s22_s0] ss:$0 sm:$0xff] }
   0x2   :  { %5 = vst [vmem:[%s23_s1] sm:$0xff] %v4_v0 }

// kernel: tile.9
= control target key start
LH: loop header
LB: loop body
LE: loop exit
PB: predicated region body
PF: predicated region fallthrough
CT: control target
= control target key end

     0   :  { %vm3_vm0 = vcmask 523264   ;;  %s19_s8 = smov 64   ;;  %vm9_vm1 = vcmask 1048064   ;;  %s39_s0 = inlined_call_operand.vmem [shape: f32[7,64], index: 0, kind: input, shape index: {}]   ;;  %s40_s1 = inlined_call_operand.vmem [shape: f32[448], index: 1, kind: output, shape index: {}]  }
   0x1   :  { %v17_v0 = vld [vmem:[%s39_s0 + $0x1] ss:$2 sm:$0x7]   ;;  %v2_v1 = vld [vmem:[%s39_s0] ss:$2 sm:$0xf]  }
   0x2   :  { %7 = vrot.lane.b32.xlu0 %v17_v0, %s19_s8  ;;  %4 = vst.msk [vmem:[#allocation0] sm:$0xf] %vm3_vm0, %v2_v1  }
  0x74   :  { %v8_v2 = vpop.permute.xlu0 %7  }
  0x75   :  { %10 = vst.msk [vmem:[#allocation0] sm:$0x7] %vm9_vm1, %v8_v2  }
  0x7c   :  { %v14_v3 = vld [vmem:[#allocation0] sm:$0xf] }
  0x7d   :  { %16 = vst [vmem:[%s40_s1] sm:$0xf] %v14_v3 }

// kernel: cnn_forward.1
= control target key start
LH: loop header
LB: loop body
LE: loop exit
PB: predicated region body
PF: predicated region fallthrough
CT: control target
= control target key end

     0   :  { %v989_v3 = vmov 0.0   ;;  %vm135_vm0 = vcmask 523264   ;;  %vm991_vm1 = vmmov 0   ;;  %vm735_vm2 = vcmask 7168   ;;  %s1475_s1 = inlined_call_operand.vmem [shape: f32[64,1024], index: 1, kind: input, shape index: {}]   ;;  %s1476_s0 = inlined_call_operand.vmem [shape: f32[8,64], index: 0, kind: input, shape index: {}]   ;;  %s1477_s3 = inlined_call_operand.vmem [shape: f32[512,64], index: 3, kind: input, shape index: {}]   ;;  %s1478_s2 = inlined_call_operand.vmem [shape: f32[1,1024], index: 2, kind: input, shape index: {}]   ;;  %s1479_s5 = inlined_call_operand.vmem [shape: f32[64,1], index: 5, kind: input, shape index: {}]   ;;  %s1480_s6 = inlined_call_operand.<no memory space> [shape: f32[1,1], index: 6, kind: input, shape index: {}]   ;;  %s1481_s4 = inlined_call_operand.vmem [shape: f32[1,64], index: 4, kind: input, shape index: {}]   ;;  %s1482_s7 = inlined_call_operand.vmem [shape: f32[8,1], index: 7, kind: output, shape index: {}]  }
   0x1   :  { %v30_v0 = vld [vmem:[%s1475_s1 + $0x8] sm:$0xff]  ;;  %v32_v2 = vld [vmem:[%s1475_s1 + $0x18] sm:$0xff]  ;;  %203 = vmatprep.mubr.f32.mxu0 %v989_v3  ;;  %274 = vmatprep.mubr.f32.mxu1 %v989_v3  ;;  %v29_v6 = vld [vmem:[%s1475_s1] sm:$0xff] }
   0x2   :  { %v38_v1 = vld [vmem:[%s1475_s1 + $0x48] sm:$0xff]  ;;  %v40_v5 = vld [vmem:[%s1475_s1 + $0x58] sm:$0xff]  ;;  %v37_v7 = vld [vmem:[%s1475_s1 + $0x40] sm:$0xff] }
   0x3   :  { %v846_v4 = vpack.c.bf16 %v38_v1, %v30_v0  ;;  %v862_v8 = vpack.c.bf16 %v40_v5, %v32_v2  ;;  %v848_v9 = vpack.c.bf16 %v37_v7, %v29_v6  ;;  %v31_v10 = vld [vmem:[%s1475_s1 + $0x10] sm:$0xff]  ;;  %v46_v12 = vld [vmem:[%s1475_s1 + $0x88] sm:$0xff]  ;;  %v48_v15 = vld [vmem:[%s1475_s1 + $0x98] sm:$0xff] }
   0x4   :  { %v39_v11 = vld [vmem:[%s1475_s1 + $0x50] sm:$0xff]  ;;  %v54_v14 = vld [vmem:[%s1475_s1 + $0xc8] sm:$0xff]  ;;  %v56_v16 = vld [vmem:[%s1475_s1 + $0xd8] sm:$0xff] }
   0x5   :  { %847 = vmatprep.subr.bf16.mxu0 %v846_v4  ;;  %v864_v13 = vpack.c.bf16 %v39_v11, %v31_v10  ;;  %863 = vmatprep.subr.bf16.mxu1 %v862_v8  ;;  %v850_v17 = vpack.c.bf16 %v54_v14, %v46_v12  ;;  %v866_v18 = vpack.c.bf16 %v56_v16, %v48_v15  ;;  %v45_v19 = vld [vmem:[%s1475_s1 + $0x80] sm:$0xff]  ;;  %v47_v21 = vld [vmem:[%s1475_s1 + $0x90] sm:$0xff]  ;;  %v62_v24 = vld [vmem:[%s1475_s1 + $0x108] sm:$0xff] }
   0x6   :  { %849 = vmatpush1.bf16.msra.mxu0 %v848_v9  ;;  %v53_v20 = vld [vmem:[%s1475_s1 + $0xc0] sm:$0xff]  ;;  %v55_v23 = vld [vmem:[%s1475_s1 + $0xd0] sm:$0xff]  ;;  %v70_v25 = vld [vmem:[%s1475_s1 + $0x148] sm:$0xff] }
   0x7   :  { %865 = vmatpush1.bf16.msra.mxu1 %v864_v13  ;;  %v852_v22 = vpack.c.bf16 %v53_v20, %v45_v19  ;;  %851 = vmatprep.subr.bf16.mxu0 %v850_v17  ;;  %v868_v26 = vpack.c.bf16 %v55_v23, %v47_v21  ;;  %v854_v27 = vpack.c.bf16 %v70_v25, %v62_v24  ;;  %v64_v28 = vld [vmem:[%s1475_s1 + $0x118] sm:$0xff]  ;;  %v61_v30 = vld [vmem:[%s1475_s1 + $0x100] sm:$0xff]  ;;  %v63_v33 = vld [vmem:[%s1475_s1 + $0x110] sm:$0xff] }
   0x8   :  { %867 = vmatprep.subr.bf16.mxu1 %v866_v18  ;;  %v72_v29 = vld [vmem:[%s1475_s1 + $0x158] sm:$0xff]  ;;  %v69_v32 = vld [vmem:[%s1475_s1 + $0x140] sm:$0xff]  ;;  %v71_v34 = vld [vmem:[%s1475_s1 + $0x150] sm:$0xff] }
   0x9   :  { %v870_v31 = vpack.c.bf16 %v72_v29, %v64_v28  ;;  %v856_v35 = vpack.c.bf16 %v69_v32, %v61_v30  ;;  %v78_v36 = vld [vmem:[%s1475_s1 + $0x188] sm:$0xff]  ;;  %v80_v38 = vld [vmem:[%s1475_s1 + $0x198] sm:$0xff]  ;;  %v872_v39 = vpack.c.bf16 %v71_v34, %v63_v33  ;;  %v77_v42 = vld [vmem:[%s1475_s1 + $0x180] sm:$0xff] }
   0xa   :  { %853 = vmatpush1.bf16.msra.mxu0 %v852_v22  ;;  %v86_v37 = vld [vmem:[%s1475_s1 + $0x1c8] sm:$0xff]  ;;  %v88_v41 = vld [vmem:[%s1475_s1 + $0x1d8] sm:$0xff]  ;;  %v85_v43 = vld [vmem:[%s1475_s1 + $0x1c0] sm:$0xff] }
   0xb   :  { %869 = vmatpush1.bf16.msra.mxu1 %v868_v26  ;;  %855 = vmatprep.subr.bf16.mxu0 %v854_v27  ;;  %v858_v40 = vpack.c.bf16 %v86_v37, %v78_v36  ;;  %v874_v44 = vpack.c.bf16 %v88_v41, %v80_v38  ;;  %v79_v45 = vld [vmem:[%s1475_s1 + $0x190] sm:$0xff]  ;;  %v34_v47 = vld [vmem:[%s1475_s1 + $0x28] sm:$0xff]  ;;  %v36_v49 = vld [vmem:[%s1475_s1 + $0x38] sm:$0xff]  ;;  %v860_v50 = vpack.c.bf16 %v85_v43, %v77_v42 }
   0xc   :  { %871 = vmatprep.subr.bf16.mxu1 %v870_v31  ;;  %v87_v46 = vld [vmem:[%s1475_s1 + $0x1d0] sm:$0xff]  ;;  %v42_v48 = vld [vmem:[%s1475_s1 + $0x68] sm:$0xff]  ;;  %v44_v51 = vld [vmem:[%s1475_s1 + $0x78] sm:$0xff] }
   0xd   :  { %v876_v52 = vpack.c.bf16 %v87_v46, %v79_v45  ;;  %v878_v53 = vpack.c.bf16 %v42_v48, %v34_v47  ;;  %v33_v54 = vld [vmem:[%s1475_s1 + $0x20] sm:$0xff]  ;;  %v35_v56 = vld [vmem:[%s1475_s1 + $0x30] sm:$0xff]  ;;  %v894_v57 = vpack.c.bf16 %v44_v51, %v36_v49  ;;  %v50_v59 = vld [vmem:[%s1475_s1 + $0xa8] sm:$0xff] }
   0xe   :  { %857 = vmatpush1.bf16.msra.mxu0 %v856_v35  ;;  %v41_v55 = vld [vmem:[%s1475_s1 + $0x60] sm:$0xff]  ;;  %v43_v58 = vld [vmem:[%s1475_s1 + $0x70] sm:$0xff]  ;;  %v58_v60 = vld [vmem:[%s1475_s1 + $0xe8] sm:$0xff] }
   0xf   :  { %873 = vmatpush1.bf16.msra.mxu1 %v872_v39  ;;  %859 = vmatprep.subr.bf16.mxu0 %v858_v40  ;;  %v52_v61 = vld [vmem:[%s1475_s1 + $0xb8] sm:$0xff]  ;;  %v1169_v63 = vld [vmem:[%s1476_s0] sm:$0xff]  ;;  %v880_v0 = vpack.c.bf16 %v41_v55, %v33_v54  ;;  %v896_v1 = vpack.c.bf16 %v43_v58, %v35_v56  ;;  %v882_v2 = vpack.c.bf16 %v58_v60, %v50_v59  ;;  %v51_v6 = vld [vmem:[%s1475_s1 + $0xb0] sm:$0xff] }
  0x10   :  { %875 = vmatprep.subr.bf16.mxu1 %v874_v44  ;;  %v60_v62 = vld [vmem:[%s1475_s1 + $0xf8] sm:$0xff]  ;;  %v49_v4 = vld [vmem:[%s1475_s1 + $0xa0] sm:$0xff]  ;;  %v59_v8 = vld [vmem:[%s1475_s1 + $0xf0] sm:$0xff] }
  0x11   :  { %v57_v5 = vld [vmem:[%s1475_s1 + $0xe0] sm:$0xff]  ;;  %v898_v7 = vpack.c.bf16 %v60_v62, %v52_v61  ;;  %v66_v9 = vld [vmem:[%s1475_s1 + $0x128] sm:$0xff]  ;;  %v68_v11 = vld [vmem:[%s1475_s1 + $0x138] sm:$0xff]  ;;  %v900_v14 = vpack.c.bf16 %v59_v8, %v51_v6 }
  0x12   :  { %861 = vmatpush1.bf16.msra.mxu0 %v860_v50  ;;  %v74_v10 = vld [vmem:[%s1475_s1 + $0x168] sm:$0xff]  ;;  %v76_v12 = vld [vmem:[%s1475_s1 + $0x178] sm:$0xff]  ;;  %v884_v13 = vpack.c.bf16 %v57_v5, %v49_v4  ;;  %v65_v16 = vld [vmem:[%s1475_s1 + $0x120] sm:$0xff] }
  0x13   :  { %877 = vmatpush1.bf16.msra.mxu1 %v876_v52  ;;  %879 = vmatprep.subr.bf16.mxu0 %v878_v53  ;;  %v886_v15 = vpack.c.bf16 %v74_v10, %v66_v9  ;;  %v73_v17 = vld [vmem:[%s1475_s1 + $0x160] sm:$0xff]  ;;  %v67_v18 = vld [vmem:[%s1475_s1 + $0x130] sm:$0xff]  ;;  %v902_v19 = vpack.c.bf16 %v76_v12, %v68_v11  ;;  %v82_v21 = vld [vmem:[%s1475_s1 + $0x1a8] sm:$0xff] }
  0x14   :  { %895 = vmatprep.subr.bf16.mxu1 %v894_v57  ;;  %v75_v20 = vld [vmem:[%s1475_s1 + $0x170] sm:$0xff]  ;;  %v90_v22 = vld [vmem:[%s1475_s1 + $0x1e8] sm:$0xff]  ;;  %v84_v23 = vld [vmem:[%s1475_s1 + $0x1b8] sm:$0xff]  ;;  %v888_v25 = vpack.c.bf16 %v73_v17, %v65_v16 }
  0x15   :  { %741 = vmatmul.mubr.msk.f32.vlgmr.msra.gmra.mrb[0].mxu0 %vm135_vm0, %v1169_v63  ;;  %v92_v24 = vld [vmem:[%s1475_s1 + $0x1f8] sm:$0xff]  ;;  %v904_v26 = vpack.c.bf16 %v75_v20, %v67_v18  ;;  %v890_v27 = vpack.c.bf16 %v90_v22, %v82_v21  ;;  %v81_v28 = vld [vmem:[%s1475_s1 + $0x1a0] sm:$0xff]  ;;  %v83_v30 = vld [vmem:[%s1475_s1 + $0x1b0] sm:$0xff] }
  0x16   :  { %742 = vmatmul.mubr.msk.f32.vlgmr.msra.gmra.mrb[0].mxu1 %vm135_vm0, %v1169_v63  ;;  %881 = vmatpush1.bf16.msra.mxu0 %v880_v0  ;;  %v89_v29 = vld [vmem:[%s1475_s1 + $0x1e0] sm:$0xff]  ;;  %v906_v31 = vpack.c.bf16 %v92_v24, %v84_v23  ;;  %v91_v32 = vld [vmem:[%s1475_s1 + $0x1f0] sm:$0xff]  ;;  %v452_v34 = vld [vmem:[%s1477_s3 + $0x88] sm:$0xff] }
  0x17   :  { %897 = vmatpush1.bf16.msra.mxu1 %v896_v1  ;;  %883 = vmatprep.subr.bf16.mxu0 %v882_v2  ;;  %v451_v33 = vld [vmem:[%s1477_s3 + $0x80] sm:$0xff]  ;;  %v484_v36 = vld [vmem:[%s1477_s3 + $0x188] sm:$0xff]  ;;  %v892_v37 = vpack.c.bf16 %v89_v29, %v81_v28  ;;  %v908_v38 = vpack.c.bf16 %v91_v32, %v83_v30  ;;  %v453_v45 = vld [vmem:[%s1477_s3 + $0x90] sm:$0xff] }
  0x18   :  { %899 = vmatprep.subr.bf16.mxu1 %v898_v7  ;;  %345 = vmatprep.mubr.f32.mxu0 %v989_v3  ;;  %v483_v35 = vld [vmem:[%s1477_s3 + $0x180] sm:$0xff]  ;;  %v910_v39 = vpack.c.bf16 %v452_v34, %v451_v33  ;;  %v436_v41 = vld [vmem:[%s1477_s3 + $0x8] sm:$0xff]  ;;  %v454_v46 = vld [vmem:[%s1477_s3 + $0x98] sm:$0xff] }
  0x19   :  { %416 = vmatprep.mubr.f32.mxu1 %v989_v3  ;;  %v435_v40 = vld [vmem:[%s1477_s3] sm:$0xff]  ;;  %v942_v43 = vpack.c.bf16 %v484_v36, %v483_v35  ;;  %v468_v44 = vld [vmem:[%s1477_s3 + $0x108] sm:$0xff]  ;;  %v485_v47 = vld [vmem:[%s1477_s3 + $0x190] sm:$0xff]  ;;  %v914_v51 = vpack.c.bf16 %v454_v46, %v453_v45 }
  0x1a   :  { %885 = vmatpush1.bf16.msra.mxu0 %v884_v13  ;;  %v467_v42 = vld [vmem:[%s1477_s3 + $0x100] sm:$0xff]  ;;  %v486_v48 = vld [vmem:[%s1477_s3 + $0x198] sm:$0xff]  ;;  %v912_v49 = vpack.c.bf16 %v436_v41, %v435_v40  ;;  %v437_v52 = vld [vmem:[%s1477_s3 + $0x10] sm:$0xff] }
  0x1b   :  { %901 = vmatpush1.bf16.msra.mxu1 %v900_v14  ;;  %887 = vmatprep.subr.bf16.mxu0 %v886_v15  ;;  %v944_v50 = vpack.c.bf16 %v468_v44, %v467_v42  ;;  %v438_v53 = vld [vmem:[%s1477_s3 + $0x18] sm:$0xff]  ;;  %v946_v54 = vpack.c.bf16 %v486_v48, %v485_v47  ;;  %v469_v55 = vld [vmem:[%s1477_s3 + $0x110] sm:$0xff]  ;;  %v455_v59 = vld [vmem:[%s1477_s3 + $0xa0] sm:$0xff] }
  0x1c   :  { %903 = vmatprep.subr.bf16.mxu1 %v902_v19  ;;  %v470_v56 = vld [vmem:[%s1477_s3 + $0x118] sm:$0xff]  ;;  %v916_v57 = vpack.c.bf16 %v438_v53, %v437_v52  ;;  %v456_v60 = vld [vmem:[%s1477_s3 + $0xa8] sm:$0xff]  ;;  %v487_v61 = vld [vmem:[%s1477_s3 + $0x1a0] sm:$0xff] }
  0x1d   :  { %v948_v58 = vpack.c.bf16 %v470_v56, %v469_v55  ;;  %v918_v62 = vpack.c.bf16 %v456_v60, %v455_v59  ;;  %v439_v0 = vld [vmem:[%s1477_s3 + $0x20] sm:$0xff]  ;;  %v440_v1 = vld [vmem:[%s1477_s3 + $0x28] sm:$0xff]  ;;  %v457_v8 = vld [vmem:[%s1477_s3 + $0xb0] sm:$0xff] }
  0x1e   :  { %889 = vmatpush1.bf16.msra.mxu0 %v888_v25  ;;  %v920_v4 = vpack.c.bf16 %v440_v1, %v439_v0  ;;  %v471_v5 = vld [vmem:[%s1477_s3 + $0x120] sm:$0xff]  ;;  %v472_v6 = vld [vmem:[%s1477_s3 + $0x128] sm:$0xff]  ;;  %v458_v9 = vld [vmem:[%s1477_s3 + $0xb8] sm:$0xff] }
  0x1f   :  { %905 = vmatpush1.bf16.msra.mxu1 %v904_v26  ;;  %891 = vmatprep.subr.bf16.mxu0 %v890_v27  ;;  %v952_v7 = vpack.c.bf16 %v472_v6, %v471_v5  ;;  %v489_v10 = vld [vmem:[%s1477_s3 + $0x1b0] sm:$0xff]  ;;  %v922_v11 = vpack.c.bf16 %v458_v9, %v457_v8  ;;  %v490_v12 = vld [vmem:[%s1477_s3 + $0x1b8] sm:$0xff]  ;;  %v459_v19 = vld [vmem:[%s1477_s3 + $0xc0] sm:$0xff]  ;;  %v990_v5 = vmov 0.0|0.0   ;;  %v95_v6 = vlaneseq }
  0x20   :  { %907 = vmatprep.subr.bf16.mxu1 %v906_v31  ;;  %v441_v13 = vld [vmem:[%s1477_s3 + $0x30] sm:$0xff]  ;;  %v442_v14 = vld [vmem:[%s1477_s3 + $0x38] sm:$0xff]  ;;  %v954_v15 = vpack.c.bf16 %v490_v12, %v489_v10  ;;  %v460_v21 = vld [vmem:[%s1477_s3 + $0xc8] sm:$0xff] }
  0x21   :  { %v924_v16 = vpack.c.bf16 %v442_v14, %v441_v13  ;;  %v473_v17 = vld [vmem:[%s1477_s3 + $0x130] sm:$0xff]  ;;  %v474_v18 = vld [vmem:[%s1477_s3 + $0x138] sm:$0xff]  ;;  %v491_v22 = vld [vmem:[%s1477_s3 + $0x1c0] sm:$0xff]  ;;  %v926_v24 = vpack.c.bf16 %v460_v21, %v459_v19 }
  0x22   :  { %893 = vmatpush1.bf16.msra.mxu0 %v892_v37  ;;  %v956_v20 = vpack.c.bf16 %v474_v18, %v473_v17  ;;  %v492_v23 = vld [vmem:[%s1477_s3 + $0x1c8] sm:$0xff]  ;;  %v443_v26 = vld [vmem:[%s1477_s3 + $0x40] sm:$0xff]  ;;  %v461_v31 = vld [vmem:[%s1477_s3 + $0xd0] sm:$0xff] }
  0x23   :  { %909 = vmatpush1.bf16.msra.mxu1 %v908_v38  ;;  %911 = vmatprep.subr.bf16.mxu0 %v910_v39  ;;  %v958_v25 = vpack.c.bf16 %v492_v23, %v491_v22  ;;  %v444_v27 = vld [vmem:[%s1477_s3 + $0x48] sm:$0xff]  ;;  %v475_v28 = vld [vmem:[%s1477_s3 + $0x140] sm:$0xff]  ;;  %v462_v32 = vld [vmem:[%s1477_s3 + $0xd8] sm:$0xff] }
  0x24   :  { %943 = vmatprep.subr.bf16.mxu1 %v942_v43  ;;  %v928_v29 = vpack.c.bf16 %v444_v27, %v443_v26  ;;  %v476_v30 = vld [vmem:[%s1477_s3 + $0x148] sm:$0xff]  ;;  %v930_v34 = vpack.c.bf16 %v462_v32, %v461_v31  ;;  %v493_v35 = vld [vmem:[%s1477_s3 + $0x1d0] sm:$0xff]  ;;  %v494_v36 = vld [vmem:[%s1477_s3 + $0x1d8] sm:$0xff] }
  0x25   :  { %743 = vmatmul.mubr.msk.f32.vlgmr.msra.gmra.mrb[2].mxu0 %vm135_vm0, %v1169_v63  ;;  %v960_v33 = vpack.c.bf16 %v476_v30, %v475_v28  ;;  %v445_v37 = vld [vmem:[%s1477_s3 + $0x50] sm:$0xff]  ;;  %v962_v38 = vpack.c.bf16 %v494_v36, %v493_v35  ;;  %v446_v39 = vld [vmem:[%s1477_s3 + $0x58] sm:$0xff]  ;;  %v463_v44 = vld [vmem:[%s1477_s3 + $0xe0] sm:$0xff] }
  0x26   :  { %744 = vmatmul.mubr.msk.f32.vlgmr.msra.gmra.mrb[2].mxu1 %vm135_vm0, %v1169_v63  ;;  %913 = vmatpush3.bf16.msra.mxu0 %v912_v49  ;;  %v488_v63 = vld [vmem:[%s1477_s3 + $0x1a8] sm:$0xff]  ;;  %v477_v40 = vld [vmem:[%s1477_s3 + $0x150] sm:$0xff]  ;;  %v478_v41 = vld [vmem:[%s1477_s3 + $0x158] sm:$0xff]  ;;  %v932_v42 = vpack.c.bf16 %v446_v39, %v445_v37 }
  0x27   :  { %945 = vmatpush3.bf16.msra.mxu1 %v944_v50  ;;  %915 = vmatprep.subr.bf16.mxu0 %v914_v51  ;;  %v950_v2 = vpack.c.bf16 %v488_v63, %v487_v61  ;;  %v964_v43 = vpack.c.bf16 %v478_v41, %v477_v40  ;;  %v464_v45 = vld [vmem:[%s1477_s3 + $0xe8] sm:$0xff]  ;;  %v495_v46 = vld [vmem:[%s1477_s3 + $0x1e0] sm:$0xff]  ;;  %v465_v56 = vld [vmem:[%s1477_s3 + $0xf0] sm:$0xff] }
  0x28   :  { %947 = vmatprep.subr.bf16.mxu1 %v946_v54  ;;  %v934_v47 = vpack.c.bf16 %v464_v45, %v463_v44  ;;  %v496_v48 = vld [vmem:[%s1477_s3 + $0x1e8] sm:$0xff]  ;;  %v447_v49 = vld [vmem:[%s1477_s3 + $0x60] sm:$0xff]  ;;  %v498_v60 = vld [vmem:[%s1477_s3 + $0x1f8] sm:$0xff] }
  0x29   :  { %v448_v50 = vld [vmem:[%s1477_s3 + $0x68] sm:$0xff]  ;;  %v966_v51 = vpack.c.bf16 %v496_v48, %v495_v46  ;;  %v479_v53 = vld [vmem:[%s1477_s3 + $0x160] sm:$0xff]  ;;  %v449_v61 = vld [vmem:[%s1477_s3 + $0x70] sm:$0xff] }
  0x2a   :  { %917 = vmatpush3.bf16.msra.mxu0 %v916_v57  ;;  %v936_v52 = vpack.c.bf16 %v448_v50, %v447_v49  ;;  %v480_v54 = vld [vmem:[%s1477_s3 + $0x168] sm:$0xff]  ;;  %v466_v57 = vld [vmem:[%s1477_s3 + $0xf8] sm:$0xff]  ;;  %v481_v1 = vld [vmem:[%s1477_s3 + $0x170] sm:$0xff] }
  0x2b   :  { %949 = vmatpush3.bf16.msra.mxu1 %v948_v58  ;;  %919 = vmatprep.subr.bf16.mxu0 %v918_v62  ;;  %v968_v55 = vpack.c.bf16 %v480_v54, %v479_v53  ;;  %v497_v58 = vld [vmem:[%s1477_s3 + $0x1f0] sm:$0xff]  ;;  %v938_v59 = vpack.c.bf16 %v466_v57, %v465_v56  ;;  %v450_v62 = vld [vmem:[%s1477_s3 + $0x78] sm:$0xff]  ;;  %v93_v13 = vld [vmem:[%s1478_s2] sm:$0xff] }
  0x2c   :  { %951 = vmatprep.subr.bf16.mxu1 %v950_v2  ;;  %v970_v63 = vpack.c.bf16 %v498_v60, %v497_v58  ;;  %v940_v0 = vpack.c.bf16 %v450_v62, %v449_v61  ;;  %v482_v2 = vld [vmem:[%s1477_s3 + $0x178] sm:$0xff]  ;;  %v648_v44 = vld [vmem:[%s1479_s5 + $0x8] sm:$0xff]  ;;  %v649_v56 = vld [vmem:[%s1479_s5 + $0x10] sm:$0xff] }
  0x2d   :  { %v650_v57 = vld [vmem:[%s1479_s5 + $0x18] sm:$0xff]  ;;  %v652_v60 = vld [vmem:[%s1479_s5 + $0x28] sm:$0xff]  ;;  %v653_v62 = vld [vmem:[%s1479_s5 + $0x30] sm:$0xff] }
  0x2e   :  { %921 = vmatpush3.bf16.msra.mxu0 %v920_v4  ;;  %v972_v4 = vpack.c.bf16 %v482_v2, %v481_v1  ;;  %v978_v58 = vpack.c.bf16 %v650_v57, %v649_v56  ;;  %v12_v1 = vstv %s1480_s6 }
  0x2f   :  { %953 = vmatpush3.bf16.msra.mxu1 %v952_v7  ;;  %923 = vmatprep.subr.bf16.mxu0 %v922_v11  ;;  %v96_v11 = vshrl.u32 %v95_v6, 7  ;;  %13 = vst [vmem:[#allocation2] sm:$0x1] %v12_v1 }
  0x30   :  { %955 = vmatprep.subr.bf16.mxu1 %v954_v15 }
  0x31   :  { %v97_v12 = vsub.s32 0, %v96_v11  ;;  %v101_v14 = vsub.s32 1, %v96_v11  ;;  %v105_v15 = vsub.s32 2, %v96_v11  ;;  %v113_v17 = vsub.s32 4, %v96_v11 }
  0x32   :  { %925 = vmatpush3.bf16.msra.mxu0 %v924_v16  ;;  %v109_v16 = vsub.s32 3, %v96_v11  ;;  %v121_v18 = vsub.s32 6, %v96_v11  ;;  %v117_v19 = vsub.s32 5, %v96_v11  ;;  %v125_v21 = vsub.s32 7, %v96_v11 }
  0x33   :  { %957 = vmatpush3.bf16.msra.mxu1 %v956_v20  ;;  %927 = vmatprep.subr.bf16.mxu0 %v926_v24  ;;  %v98_v20 = vrot.slane %v93_v13, %v97_v12  ;;  %v102_v22 = vrot.slane %v93_v13, %v101_v14  ;;  %v106_v23 = vrot.slane %v93_v13, %v105_v15 }
  0x34   :  { %959 = vmatprep.subr.bf16.mxu1 %v958_v25  ;;  %v110_v24 = vrot.slane %v93_v13, %v109_v16  ;;  %v114_v25 = vrot.slane %v93_v13, %v113_v17  ;;  %v122_v26 = vrot.slane %v93_v13, %v121_v18  ;;  %v118_v27 = vrot.slane %v93_v13, %v117_v19 }
  0x36   :  { %929 = vmatpush3.bf16.msra.mxu0 %v928_v29  ;;  %v126_v29 = vrot.slane %v93_v13, %v125_v21 }
  0x37   :  { %961 = vmatpush3.bf16.msra.mxu1 %v960_v33  ;;  %931 = vmatprep.subr.bf16.mxu0 %v930_v34 }
  0x38   :  { %963 = vmatprep.subr.bf16.mxu1 %v962_v38 }
  0x3a   :  { %933 = vmatpush3.bf16.msra.mxu0 %v932_v42 }
  0x3b   :  { %965 = vmatpush3.bf16.msra.mxu1 %v964_v43  ;;  %935 = vmatprep.subr.bf16.mxu0 %v934_v47  ;;  %v647_v43 = vld [vmem:[%s1479_s5] sm:$0xff] }
  0x3c   :  { %967 = vmatprep.subr.bf16.mxu1 %v966_v51  ;;  %v975_v54 = vpack.c.bf16 %v648_v44, %v647_v43 }
  0x3e   :  { %937 = vmatpush3.bf16.msra.mxu0 %v936_v52 }
  0x3f   :  { %969 = vmatpush3.bf16.msra.mxu1 %v968_v55  ;;  %939 = vmatprep.subr.bf16.mxu0 %v938_v59  ;;  %v651_v59 = vld [vmem:[%s1479_s5 + $0x20] sm:$0xff] }
  0x40   :  { %971 = vmatprep.subr.bf16.mxu1 %v970_v63  ;;  %v981_v61 = vpack.c.bf16 %v652_v60, %v651_v59  ;;  %v654_v63 = vld [vmem:[%s1479_s5 + $0x38] sm:$0xff] }
  0x42   :  { %941 = vmatpush3.bf16.msra.mxu0 %v940_v0  ;;  %v984_v0 = vpack.c.bf16 %v654_v63, %v653_v62 }
  0x43   :  { %973 = vmatpush3.bf16.msra.mxu1 %v972_v4  ;;  %974 = vmatprep.subr.bf16.mxu0 %v990_v5 }
  0xe8   :  { %v205_v7 = vpop.f32.mrb[0].mxu0 }
  0xe9   :  { %v207_v8 = vpop.f32.mrb[1].mxu0  ;;  %v276_v9 = vpop.f32.mrb[0].mxu1  ;;  %v206_v28 = vadd.f32 %v205_v7, %v98_v20 }
  0xea   :  { %v278_v10 = vpop.f32.mrb[1].mxu1  ;;  %v208_v30 = vadd.f32 %v207_v8, %v102_v22  ;;  %v277_v31 = vadd.f32 %v276_v9, %v106_v23 }
  0xeb   :  { %v279_v33 = vadd.f32 %v278_v10, %v110_v24  ;;  %v423_v40 = vmax.f32 %v206_v28, 0.0 }
  0xec   :  { %v424_v45 = vmax.f32 %v208_v30, 0.0  ;;  %v425_v46 = vmax.f32 %v277_v31, 0.0 }
  0xed   :  { %v426_v49 = vmax.f32 %v279_v33, 0.0 }
  0xf8   :  { %v347_v32 = vpop.f32.mrb[2].mxu0 }
  0xf9   :  { %v348_v34 = vadd.f32 %v347_v32, %v114_v25  ;;  %v418_v35 = vpop.f32.mrb[2].mxu1  ;;  %v349_v36 = vpop.f32.mrb[3].mxu0 }
  0xfa   :  { %v419_v37 = vadd.f32 %v418_v35, %v122_v26  ;;  %v350_v38 = vadd.f32 %v349_v36, %v118_v27  ;;  %v420_v39 = vpop.f32.mrb[3].mxu1 }
  0xfb   :  { %v427_v41 = vmax.f32 %v348_v34, 0.0  ;;  %v421_v42 = vadd.f32 %v420_v39, %v126_v29 }
  0xfc   :  { %v429_v47 = vmax.f32 %v419_v37, 0.0  ;;  %v428_v48 = vmax.f32 %v350_v38, 0.0 }
  0xfd   :  { %v431_v50 = vmax.f32 %v423_v40, %v427_v41  ;;  %v430_v51 = vmax.f32 %v421_v42, 0.0 }
  0xfe   :  { %v433_v52 = vmax.f32 %v425_v46, %v429_v47  ;;  %v432_v53 = vmax.f32 %v424_v45, %v428_v48 }
  0xff   :  { %v434_v55 = vmax.f32 %v426_v49, %v430_v51 }
 0x100   :  { %570 = vmatprep.mubr.f32.mxu0 %v432_v53 }
 0x101   :  { %640 = vmatprep.mubr.f32.mxu1 %v434_v55  ;;  %571 = vmatmul.mubr.f32.vlgmr.msra.gmra.mrb[4].mxu0 %v431_v50 }
 0x102   :  { %641 = vmatmul.mubr.f32.vlgmr.msra.gmra.mrb[4].mxu1 %v433_v52  ;;  %976 = vmatpush3.bf16.msra.mxu0 %v975_v54 }
 0x103   :  { %977 = vmatprep.subr.bf16.mxu0 %v990_v5  ;;  %843 = vmatprep.mubr.msk.f32.mxu0 %vm991_vm1, %v989_v3  ;;  %v746_v3 = vld [vmem:[#allocation2] ss:$0 sm:$0xff] }
 0x106   :  { %979 = vmatpush3.bf16.msra.mxu0 %v978_v58 }
 0x107   :  { %980 = vmatprep.subr.bf16.mxu0 %v990_v5 }
 0x10a   :  { %982 = vmatpush3.bf16.msra.mxu0 %v981_v61 }
 0x10b   :  { %983 = vmatprep.subr.bf16.mxu0 %v990_v5  ;;  %v745_v5 = vld [vmem:[%s1481_s4] ss:$0 sm:$0xff] }
 0x10e   :  { %985 = vmatpush3.bf16.msra.mxu0 %v984_v0 }
 0x1d4   :  { %v780_v2 = vpop.f32.mrb[4].mxu0 }
 0x1d5   :  { %v815_v4 = vpop.f32.mrb[4].mxu1  ;;  %v781_v6 = vpop.f32.mrb[5].mxu0 }
 0x1d6   :  { %v782_v7 = vadd.f32 %v781_v6, %v780_v2  ;;  %v816_v8 = vpop.f32.mrb[5].mxu1 }
 0x1d7   :  { %v817_v9 = vadd.f32 %v816_v8, %v815_v4 }
 0x1d8   :  { %v573_v10 = vadd.f32 %v782_v7, %v745_v5 }
 0x1da   :  { %v643_v11 = vadd.f32 %v817_v9, %v573_v10 }
 0x1dc   :  { %v646_v12 = vmax.f32 %v643_v11, 0.0 }
 0x1de   :  { %844 = vmatmul.mubr.msk.f32.vlgmr.msra.gmra.mrb[6].mxu0 %vm135_vm0, %v646_v12 }
 0x2b1   :  { %v731_v13 = vpop.f32.mrb[6].mxu0 }
 0x2b2   :  { %v732_v14 = vadd.f32 %v746_v3, %v731_v13  ;;  %v845_v15 = vpop.f32.mrb[7].mxu0 }
 0x2b4   :  { %736 = vst.msk [vmem:[%s1482_s7] sm:$0xff] %vm735_vm2, %v732_v14 }

</bundles_post_ra>
